<compile_context>
chip_gen: v5e
topology: v5e:2x2
jax: 0.10.0
libtpu: 0.0.40
codegen_flags: <defaults>
</compile_context>

<pallas_src>
import jax
import jax.numpy as jnp
from jax.experimental import pallas as pl
from jax.experimental.pallas import tpu as pltpu

_LANE = 128                      # TPU vreg lane width
_MAX_COLS = 2048                 # lane-dense target (review: >=512, ~2048 on v6e)
_TARGET_BLOCK_BYTES = 2 << 20    # 2 MiB blocks: 4 live buffers (in + out, each
                                 # double-buffered) = 8 MiB < v5e's 16 MiB scoped VMEM.


def _copy_kernel(x_ref, o_ref):
    # Whole-tile load/store; the "hot path" of the (empty) reference forward.
    o_ref[...] = x_ref[...]


def crnn_forward(x: jax.Array) -> jax.Array:
    """Pallas implementation of CRNN.forward (identity pass-through)."""
    orig_shape = x.shape
    total = x.size

    if total == 0:
        return x

    if total % _LANE != 0:
        # Odd element counts: single full-array block (full-dim escape hatch of
        # the (8, 128) rule).  Not lane-dense, but correct for any shape.
        spec = pl.BlockSpec(orig_shape, lambda *_: (0,) * len(orig_shape))
        return pl.pallas_call(
            _copy_kernel,
            out_shape=jax.ShapeDtypeStruct(orig_shape, x.dtype),
            in_specs=[spec],
            out_specs=spec,
            input_output_aliases={0: 0},
        )(x)

    # Lane-dense 2D factorization: cols = largest multiple of 128 that divides
    # the element count (capped at 2048), so every vector store uses all 128
    # lanes (unmasked vst) instead of 16/128-lane masked partial stores.
    cols = _LANE
    while cols < _MAX_COLS and total % (cols * 2) == 0:
        cols *= 2
    rows = total // cols
    x2 = x.reshape(rows, cols)

    # Row blocks sized for ~2 MiB per block (multiple of 8 sublanes); the grid
    # iterates over row blocks.  Small inputs (like the demo below) collapse to
    # a single block and a single grid step, avoiding per-step overhead.
    row_bytes = cols * x2.dtype.itemsize
    budget_rows = max(1, _TARGET_BLOCK_BYTES // row_bytes)
    if rows <= budget_rows:
        block_rows = rows                       # one block covers everything
    else:
        block_rows = max(8, (budget_rows // 8) * 8)
    grid = (pl.cdiv(rows, block_rows),)

    spec = pl.BlockSpec((block_rows, cols), lambda i: (i, 0))
    out2 = pl.pallas_call(
        _copy_kernel,
        out_shape=jax.ShapeDtypeStruct((rows, cols), x2.dtype),
        grid=grid,
        in_specs=[spec],
        out_specs=spec,
        input_output_aliases={0: 0},
        compiler_params=pltpu.CompilerParams(
            dimension_semantics=("parallel",),  # shard row blocks across TCs (v7x)
        ),
    )(x2)
    return out2.reshape(orig_shape)


if __name__ == "__main__":
    key = jax.random.PRNGKey(0)
    # Small, deterministic NCHW input consistent with an OCR-style image batch.
    x = jax.random.normal(key, (2, 4, 16, 16), dtype=jnp.float32)

    out = crnn_forward(x)
    out = jax.block_until_ready(out)

    # Sanity check: identity kernel must reproduce the input exactly.
    assert out.shape == x.shape and out.dtype == x.dtype
    assert bool(jnp.all(out == x))

    print("KERNEL_OK")
</pallas_src>

<mosaic_0001>
module attributes {stable_mosaic.version = 11 : i64} {
  func.func @_copy_kernel(%arg0: i32, %arg1: memref<1x2048xf32, #tpu.memory_space<vmem>>, %arg2: memref<1x2048xf32, #tpu.memory_space<vmem>>) attributes {dimension_semantics = [#tpu.dimension_semantics<parallel>], iteration_bounds = array<i64: 1>, scalar_prefetch = 0 : i64, scratch_operands = 0 : i64, tpu.core_type = #tpu.core_type<tc>, window_params = [{transform_indices = @transform_0, window_bounds = array<i64: 1, 2048>}, {transform_indices = @transform_1, window_bounds = array<i64: 1, 2048>}]} {
    %c0 = arith.constant 0 : index
    %c0_0 = arith.constant 0 : index
    %0 = vector.load %arg1[%c0, %c0_0] : memref<1x2048xf32, #tpu.memory_space<vmem>>, vector<1x2048xf32>
    %c0_1 = arith.constant 0 : index
    %c0_2 = arith.constant 0 : index
    %1 = vector.load %arg2[%c0_1, %c0_2] : memref<1x2048xf32, #tpu.memory_space<vmem>>, vector<1x2048xf32>
    tpu.vector_store %arg2[%c0_1, %c0_2], %0 {strides = array<i32>} : memref<1x2048xf32, #tpu.memory_space<vmem>>, vector<1x2048xf32>,
    return
  }
  func.func @transform_0(%arg0: i32) -> (i32, i32) {
    %c0_i32 = arith.constant 0 : i32
    %c0_i32_0 = arith.constant 0 : i32
    return %arg0, %c0_i32 : i32, i32
  }
  func.func @transform_1(%arg0: i32) -> (i32, i32) {
    %c0_i32 = arith.constant 0 : i32
    %c0_i32_0 = arith.constant 0 : i32
    return %arg0, %c0_i32 : i32, i32
  }
}

</mosaic_0001>

<bundles_post_ra>
// kernel: tpu_custom_call.1
= control target key start
LH: loop header
LB: loop body
LE: loop exit
PB: predicated region body
PF: predicated region fallthrough
CT: control target
= control target key end

     0   :  { %6 = vsyncpa [#allocation3], 0  ;;  %s116_s0 = inlined_call_operand.hbm [shape: f32[1,2048], index: 0, kind: input, shape index: {}, may-alias: {0,1}]   ;;  %s117_s1 = inlined_call_operand.hbm [shape: f32[1,2048], index: 1, kind: output, shape index: {}, may-alias: {0,1}]  }
   0x1   :  { %7 = vsyncpa [#allocation4], 0  ;;  %s13_s8 = sshll.u32 %s116_s0, 4  ;;  %s98_s9 = smov [#allocation2]   ;;  %s14_s8 = int_to_ptr.hbm [resolvable:$true] %s13_s8 }
   0x2   :  { %s15_s10 = sshll.u32 %s98_s9, 4  ;;  %s16_s10 = int_to_ptr.vmem [resolvable:$true] %s15_s10 }
   0x3   :  { %18 = dma.hbm_to_vmem [thread:$0]  %s14_s8, 256, %s16_s10, [#allocation3]  }
   0x4   :  { %94 = dma.done.wait [#allocation3], 256  }
   0x5   :  { %95 = vsyncadd [#allocation3], 4294967040  ;;  %s99_s11 = smov [#allocation5]   ;;  %s34_s15 = sshll.u32 %s117_s1, 4  ;;  %v23_v0 = vld [vmem:[#allocation2] sm:$0xff]  ;;  %v24_v1 = vld [vmem:[#allocation2 + $0x8] sm:$0xff]  ;;  %s35_s15 = int_to_ptr.hbm [resolvable:$true] %s34_s15 }
   0x6   :  { %s32_s12 = sshll.u32 %s99_s11, 4  ;;  %25 = vst [vmem:[#allocation5] sm:$0xff] %v23_v0  ;;  %s33_s12 = int_to_ptr.vmem [resolvable:$true] %s32_s12 }
   0x7   :  { %26 = vst [vmem:[#allocation5 + $0x8] sm:$0xff] %v24_v1 }
   0x8   :  { %37 = dma.vmem_to_hbm [thread:$0]  %s33_s12, 256, %s35_s15, [#allocation4]  }
   0x9   :  { %96 = dma.done.wait [#allocation4], 256  }
   0xa   :  { %97 = vsyncadd [#allocation4], 4294967040 }
   0xb   :  { %42 = vsyncpa [#allocation3], 1 }
   0xc   :  { %43 = vsyncpa [#allocation4], 1 }

</bundles_post_ra>
